<compile_context>
chip_gen: v6e
topology: v6e:2x2x1
jax: 0.10.0
libtpu: 0.0.40
codegen_flags: <defaults>
</compile_context>

<pallas_src>
import functools

import jax
import jax.numpy as jnp
from jax import lax
from jax.experimental import pallas as pl
from jax.experimental.pallas import tpu as pltpu


def _vmem():
    return pl.BlockSpec(memory_space=pltpu.MemorySpace.VMEM)


def _round_up(x, m):
    return ((x + m - 1) // m) * m


# ---------------------------------------------------------------------------
# Kernel 1: edge prologue (fused __get_logits__ + data_edge_freq).
#   edge_logits[e]   = sum_f edge_attr[e, f] * w[f] + b   (VPU, not MXU)
#   data_edge_freq[f] = sum_e edge_attr[e, f]
# edge_attr is passed transposed (F, E) so E sits on lanes (lane-dense).
# ---------------------------------------------------------------------------
def _edge_prologue_kernel(attr_t_ref, w_ref, b_ref, logit_ref, freq_ref):
    attr_t = attr_t_ref[...]                                   # (F, E) f32
    w = w_ref[...]                                             # (F, 1) f32
    b = b_ref[...]                                             # (1, 1) f32
    logit_ref[...] = jnp.sum(attr_t * w, axis=0, keepdims=True) + b   # (1, E)
    freq_ref[...] = jnp.sum(attr_t, axis=1, keepdims=True)            # (F, 1)


def edge_prologue(attr_t, w, b):
    fdim, e = attr_t.shape
    return pl.pallas_call(
        _edge_prologue_kernel,
        out_shape=(jax.ShapeDtypeStruct((1, e), jnp.float32),
                   jax.ShapeDtypeStruct((fdim, 1), jnp.float32)),
        in_specs=[_vmem(), _vmem(), _vmem()],
        out_specs=(_vmem(), _vmem()),
    )(attr_t, w, b)


# ---------------------------------------------------------------------------
# Kernel 2: fused per-hop kernel.
#   khop[e]   = frontier[src[e]] or frontier[dst[e]]
#   mlogit[e] = edge_logits[e] if khop[e] else -1e30
# The frontier is a fixed-size node-presence column (NODE_PAD, 1) so the kernel
# never recompiles as the frontier changes; membership is a broadcast-compare
# against a sublane iota + sublane max-reduce, giving a lane-dense (1, E) output.
# ---------------------------------------------------------------------------
def _hop_kernel(src_ref, dst_ref, pres_ref, logit_ref, mlogit_ref, khop_ref):
    src = src_ref[...]                                         # (1, E) int32
    dst = dst_ref[...]                                         # (1, E) int32
    pres = pres_ref[...]                                       # (P, 1) f32 {0,1}
    logits = logit_ref[...]                                    # (1, E) f32
    p = pres.shape[0]
    node_ids = lax.broadcasted_iota(jnp.int32, (p, 1), 0)      # (P, 1)
    hit_src = jnp.max(jnp.where(src == node_ids, pres, 0.0), axis=0, keepdims=True)
    hit_dst = jnp.max(jnp.where(dst == node_ids, pres, 0.0), axis=0, keepdims=True)
    khop = (hit_src + hit_dst) > 0.0                           # (1, E) bool
    khop_ref[...] = khop.astype(jnp.float32)
    mlogit_ref[...] = jnp.where(khop, logits, -1e30)


def hop_membership(src_row, dst_row, presence_col, edge_logits):
    e = src_row.shape[1]
    return pl.pallas_call(
        _hop_kernel,
        out_shape=(jax.ShapeDtypeStruct((1, e), jnp.float32),
                   jax.ShapeDtypeStruct((1, e), jnp.float32)),
        in_specs=[_vmem(), _vmem(), _vmem(), _vmem()],
        out_specs=(_vmem(), _vmem()),
    )(src_row, dst_row, presence_col, edge_logits)


# ---------------------------------------------------------------------------
# Kernel 3: sample epilogue.
#   scaled[f, e]   = edge_attr[e, f] * keep[e]
#   sample_freq[f] = sum_e scaled[f, e]
# `keep` already folds the clamped sample mask and the self-loop removal.
# ---------------------------------------------------------------------------
def _sample_epilogue_kernel(attr_t_ref, keep_ref, scaled_ref, freq_ref):
    scaled = attr_t_ref[...] * keep_ref[...]                   # (F, E)
    scaled_ref[...] = scaled
    freq_ref[...] = jnp.sum(scaled, axis=1, keepdims=True)     # (F, 1)


def sample_epilogue(attr_t, keep):
    fdim, e = attr_t.shape
    return pl.pallas_call(
        _sample_epilogue_kernel,
        out_shape=(jax.ShapeDtypeStruct((fdim, e), jnp.float32),
                   jax.ShapeDtypeStruct((fdim, 1), jnp.float32)),
        in_specs=[_vmem(), _vmem()],
        out_specs=(_vmem(), _vmem()),
    )(attr_t, keep)


# ---------------------------------------------------------------------------
# Kernel 4: fused GNN readout (adjacency build + 3 matmuls + bias/ReLU + pool).
#   A[i, j] = 1 if a kept edge (src=j -> dst=i) exists in the (already
#             undirected-doubled) edge list; built via one-hot MXU matmul.
#   out = mean_nodes(relu(A @ (x @ W1) + b1)) @ W2 + b2
# ---------------------------------------------------------------------------
def _gnn_readout_kernel(dst_row_ref, src_col_ref, keep_ref, x_ref,
                        w1_ref, b1_ref, w2_ref, b2_ref, out_ref):
    dst_row = dst_row_ref[...]                                 # (1, Eu) int32
    src_col = src_col_ref[...]                                 # (Eu, 1) int32
    keep = keep_ref[...]                                       # (1, Eu) f32
    x = x_ref[...]                                             # (N, Fx) f32
    n = x.shape[0]
    node_col = lax.broadcasted_iota(jnp.int32, (n, 1), 0)      # (N, 1)
    node_row = lax.broadcasted_iota(jnp.int32, (1, n), 1)      # (1, N)
    onehot_dst = jnp.where(dst_row == node_col, keep, 0.0)     # (N, Eu) weighted
    onehot_src = (src_col == node_row).astype(jnp.float32)     # (Eu, N)
    a = jnp.dot(onehot_dst, onehot_src, preferred_element_type=jnp.float32)
    adj = (a > 0.0).astype(jnp.float32)                        # (N, N) binary
    xw = jnp.dot(x, w1_ref[...], preferred_element_type=jnp.float32)
    h = jnp.maximum(jnp.dot(adj, xw, preferred_element_type=jnp.float32)
                    + b1_ref[...], 0.0)                        # (N, H)
    pooled = jnp.sum(h, axis=0, keepdims=True) * (1.0 / n)     # (1, H)
    out_ref[...] = (jnp.dot(pooled, w2_ref[...],
                            preferred_element_type=jnp.float32)
                    + b2_ref[...])                             # (1, out_dim)


def gnn_readout(dst_row, src_col, keep, x, w1, b1, w2, b2):
    out_dim = w2.shape[1]
    return pl.pallas_call(
        _gnn_readout_kernel,
        out_shape=jax.ShapeDtypeStruct((1, out_dim), jnp.float32),
        in_specs=[_vmem()] * 8,
        out_specs=_vmem(),
    )(dst_row, src_col, keep, x, w1, b1, w2, b2)


# ---------------------------------------------------------------------------
# Device-side sampling pipeline (maps to __get_logits__ + __build__ +
# __sample_subgraph__ of the PyTorch module).  All shapes static, hop loop
# unrolled at trace time, no host syncs, compiled once.
# ---------------------------------------------------------------------------
@functools.partial(jax.jit, static_argnames=("num_hops", "sizes", "node_pad"))
def _sampling_core(src_row, dst_row, attr_t, target_flat, hop_keys,
                   w_logit, b_logit, *, num_hops, sizes, node_pad):
    e = src_row.shape[1]

    # __get_logits__ (linear layer over edge features) + data_edge_freq, fused.
    edge_logits, data_freq = edge_prologue(attr_t, w_logit, b_logit)

    # n_id[0] = unique(target_edge_index), as a fixed-size presence vector.
    presence = jnp.zeros((node_pad,), jnp.float32).at[target_flat].set(1.0)

    sample_mask = jnp.zeros((1, e), jnp.float32)
    sample_logit = jnp.float32(0.0)

    for k in range(1, num_hops + 1):
        masked_logits, khop = hop_membership(src_row, dst_row,
                                             presence[:, None], edge_logits)
        khop_any = jnp.sum(khop) > 0.0          # device predicate, no host sync
        frontier_count = jnp.sum(presence)      # |n_id[-1]|
        max_samples = node_pad * sizes[k - 1]   # static upper bound
        to_sample = frontier_count * sizes[k - 1]

        # torch.multinomial(softmax(logits[khop]), replacement=True) ==
        # categorical over the masked logits.
        # TODO(synk): torch.multinomial's RNG stream is not reproducible in JAX.
        ids = jax.random.categorical(hop_keys[k - 1], masked_logits[0],
                                     shape=(max_samples,))
        valid = (jnp.arange(max_samples) < to_sample) & khop_any
        validf = valid.astype(jnp.float32)

        hop_mask = jnp.zeros((e,), jnp.float32).at[ids].max(validf)
        sample_mask = sample_mask + hop_mask[None, :]
        sample_logit = sample_logit + jnp.sum(edge_logits[0, ids] * validf)

        # PyTorch quirk preserved: next frontier = unique(dst * cumulative mask)
        # (mask values > 1 create "phantom" node ids that still count toward
        #  |n_id|; node_pad is sized to hold them).
        frontier_ids = jnp.clip(
            (dst_row[0].astype(jnp.float32) * sample_mask[0]).astype(jnp.int32),
            0, node_pad - 1)
        new_presence = jnp.zeros((node_pad,), jnp.float32).at[frontier_ids].set(1.0)
        presence = jnp.where(khop_any, new_presence, presence)

    sample_mask = jnp.clip(sample_mask, 0.0, 1.0)

    # remove_self_loops is realized as the (src != dst) factor of `keep`
    # (unsampled edges already carry zero weight), so no dynamic-shape
    # compaction or host round trip is needed.
    keep = sample_mask * (src_row != dst_row).astype(jnp.float32)
    scaled_attr_t, sample_freq = sample_epilogue(attr_t, keep)

    data_freq_v = data_freq[:, 0]
    order = jnp.argsort(-data_freq_v)
    sample_freq_sorted = sample_freq[:, 0][order]
    frac_sampled = sample_freq_sorted / data_freq_v[order]

    return (sample_mask, keep, scaled_attr_t,
            sample_freq_sorted, frac_sampled, sample_logit)


@jax.jit
def _gnn_forward(src_row, dst_row, keep, x, w1, b1, w2, b2):
    e_u = src_row.shape[1]
    src_col = src_row.reshape(e_u, 1)
    return gnn_readout(dst_row, src_col, keep, x, w1, b1, w2, b2)


# ---------------------------------------------------------------------------
# Plain-python glue (Data container, running average, undirected doubling)
# ---------------------------------------------------------------------------
class Data:
    """Flexible container mirroring torch_geometric.data.Data."""

    def __init__(self, **kwargs):
        self.__dict__.update(kwargs)


class RunningAverage:
    def __init__(self, dim):
        self.count = 0
        self.avg = jnp.zeros((dim,), jnp.float32)

    def add_item(self, item):
        self.avg = (self.avg * self.count + item) / (self.count + 1)
        self.count += 1


def data_to_undirected(sample):
    """Double the (masked) edge list with the reversed direction appended."""
    return Data(
        x=sample.x,
        src_row=jnp.concatenate([sample.src_row, sample.dst_row], axis=1),
        dst_row=jnp.concatenate([sample.dst_row, sample.src_row], axis=1),
        edge_keep=jnp.concatenate([sample.edge_keep, sample.edge_keep], axis=1),
        edge_attr_t=jnp.concatenate([sample.edge_attr_t, sample.edge_attr_t], axis=1),
        edge_index=jnp.concatenate([sample.edge_index, sample.edge_index[::-1]], axis=1),
        y=sample.y,
        target_edge_index=sample.target_edge_index,
    )


class SimpleGNNModel:
    """Toy GNN standing in for the abstract `model`:
       mean-pool(relu(A @ (x @ W1) + b1)) @ W2 + b2, fully fused in one Pallas
       kernel; the adjacency is built on device from the kept edge list."""

    def __init__(self, in_dim, hidden, out_dim, key):
        self.out_dim = out_dim
        k1, k2 = jax.random.split(key)
        self.W1 = jax.random.normal(k1, (in_dim, hidden), jnp.float32) * 0.1
        self.b1 = jnp.zeros((1, hidden), jnp.float32)
        self.W2 = jax.random.normal(k2, (hidden, out_dim), jnp.float32) * 0.1
        self.b2 = jnp.zeros((1, out_dim), jnp.float32)

    def __call__(self, sample):
        # sample.edge_attr_t is carried for API faithfulness; this toy model
        # (like the previous adjacency-only stand-in) does not consume it.
        return _gnn_forward(sample.src_row, sample.dst_row, sample.edge_keep,
                            sample.x, self.W1, self.b1, self.W2, self.b2)


class Args:
    def __init__(self, device, model_depth):
        self.device = device
        self.model_depth = model_depth


# ---------------------------------------------------------------------------
# SamplingImpl in JAX / Pallas
# ---------------------------------------------------------------------------
class SamplingImpl:
    def __init__(self, model, args, size, edge_feat_dim, key):
        self.model = model
        self.size = tuple(int(s) for s in size)
        self.device = args.device
        self.num_hops = int(args.model_depth)
        out_dim = model.out_dim
        self.average_frac_sampled = RunningAverage(out_dim)
        self.average_sampled = RunningAverage(out_dim)
        self.subgraph_logit = jnp.float32(0.0)
        # concrete __get_logits__: linear layer over edge features
        k1, self.key = jax.random.split(key)
        self.w_logit = jax.random.normal(k1, (edge_feat_dim, 1), jnp.float32) * 0.5
        self.b_logit = jnp.zeros((1, 1), jnp.float32)

    def forward(self, data):
        e = int(data.edge_index.shape[1])
        n = int(data.x.shape[0])
        # lane-dense device layouts (E on lanes), built once per forward
        src_row = data.edge_index[0].reshape(1, e).astype(jnp.int32)
        dst_row = data.edge_index[1].reshape(1, e).astype(jnp.int32)
        attr_t = data.edge_attr.T.astype(jnp.float32)            # (F, E)
        target_flat = data.target_edge_index.reshape(-1).astype(jnp.int32)

        # fixed presence-vector width: real node ids plus the "phantom" ids the
        # PyTorch quirk (dst * cumulative mask) can produce; multiple of 8.
        node_pad = _round_up(max(n, (n - 1) * self.num_hops + 1), 8)

        self.key, sub = jax.random.split(self.key)
        hop_keys = jax.random.split(sub, self.num_hops)

        (sample_mask, keep, scaled_attr_t, sample_freq_sorted, frac_sampled,
         subgraph_logit) = _sampling_core(
            src_row, dst_row, attr_t, target_flat, hop_keys,
            self.w_logit, self.b_logit,
            num_hops=self.num_hops, sizes=self.size, node_pad=node_pad)

        self.subgraph_logit = subgraph_logit
        self.average_sampled.add_item(sample_freq_sorted)
        self.average_frac_sampled.add_item(frac_sampled)

        # __sample_subgraph__ output in padded-mask form (unsampled / self-loop
        # rows carry zero weight instead of being compacted on the host).
        masked_edge_index = (data.edge_index.astype(jnp.float32)
                             * sample_mask).astype(jnp.int32)
        sample = Data(x=data.x.astype(jnp.float32),
                      edge_index=masked_edge_index,
                      edge_attr_t=scaled_attr_t,
                      src_row=src_row, dst_row=dst_row, edge_keep=keep,
                      y=data.y, target_edge_index=data.target_edge_index)

        sample = data_to_undirected(sample)
        return self.model(sample)

    __call__ = forward


# ---------------------------------------------------------------------------
# Driver
# ---------------------------------------------------------------------------
if __name__ == "__main__":
    key = jax.random.PRNGKey(0)
    k_x, k_ea, k_model, k_impl = jax.random.split(key, 4)

    N = 16          # nodes
    Fx = 8          # node feature dim
    E = 64          # edges
    F = 8           # edge feature dim == model.out_dim
    hidden = 32
    num_hops = 2
    size = [2, 1]

    # deterministic graph with no self loops
    idx = jnp.arange(E, dtype=jnp.int32)
    src = idx % N
    dst = (idx * 3 + 1) % N
    dst = jnp.where(dst == src, (dst + 1) % N, dst)
    edge_index = jnp.stack([src, dst], axis=0)                   # (2, E) int32

    x = jax.random.normal(k_x, (N, Fx), jnp.float32)
    edge_attr = jax.random.uniform(k_ea, (E, F), jnp.float32,
                                   minval=0.1, maxval=1.0)
    y = jnp.zeros((1,), jnp.float32)
    target_edge_index = jnp.array([[0, 2], [1, 3]], dtype=jnp.int32)  # (2, 2)

    data = Data(x=x, edge_index=edge_index, edge_attr=edge_attr, y=y,
                target_edge_index=target_edge_index)

    model = SimpleGNNModel(Fx, hidden, F, k_model)
    args = Args(device="tpu", model_depth=num_hops)
    sampler = SamplingImpl(model, args, size, edge_feat_dim=F, key=k_impl)

    out = sampler(data)
    out = jax.block_until_ready(out)
    assert out.shape == (1, F)
    assert bool(jnp.all(jnp.isfinite(out)))
    print("KERNEL_OK")
</pallas_src>

<mosaic_0001>
module attributes {stable_mosaic.version = 11 : i64} {
  func.func private @main(%arg0: i32) attributes {dimension_semantics = [#tpu.dimension_semantics<core_parallel>], iteration_bounds = array<i64: 2>, tpu.core_type = #tpu.core_type<sc_scalar_subcore>, window_params = []} {
    return
  }
}

module attributes {stable_mosaic.version = 11 : i64} {
  func.func private @main(%arg0: i32) attributes {dimension_semantics = [#tpu.dimension_semantics<core_parallel>], iteration_bounds = array<i64: 2>, tpu.core_type = #tpu.core_type<sc_scalar_subcore>, window_params = []} {
    return
  }
}

module attributes {stable_mosaic.version = 11 : i64} {
  func.func @_hop_kernel(%arg0: memref<1x64xi32, #tpu.memory_space<vmem>>, %arg1: memref<1x64xi32, #tpu.memory_space<vmem>>, %arg2: memref<32x1xf32, #tpu.memory_space<vmem>>, %arg3: memref<1x64xf32, #tpu.memory_space<vmem>>, %arg4: memref<1x64xf32, #tpu.memory_space<vmem>>, %arg5: memref<1x64xf32, #tpu.memory_space<vmem>>) attributes {dimension_semantics = [], scalar_prefetch = 0 : i64, scratch_operands = 0 : i64, tpu.core_type = #tpu.core_type<tc>} {
    %c0 = arith.constant 0 : index
    %c0_0 = arith.constant 0 : index
    %0 = vector.load %arg0[%c0, %c0_0] : memref<1x64xi32, #tpu.memory_space<vmem>>, vector<1x64xi32>
    %c0_1 = arith.constant 0 : index
    %c0_2 = arith.constant 0 : index
    %1 = vector.load %arg1[%c0_1, %c0_2] : memref<1x64xi32, #tpu.memory_space<vmem>>, vector<1x64xi32>
    %c0_3 = arith.constant 0 : index
    %c0_4 = arith.constant 0 : index
    %2 = vector.load %arg2[%c0_3, %c0_4] : memref<32x1xf32, #tpu.memory_space<vmem>>, vector<32x1xf32>
    %c0_5 = arith.constant 0 : index
    %c0_6 = arith.constant 0 : index
    %3 = vector.load %arg3[%c0_5, %c0_6] : memref<1x64xf32, #tpu.memory_space<vmem>>, vector<1x64xf32>
    %4 = tpu.iota {dimensions = array<i32: 0>} : vector<32x1xi32>
    %5 = vector.broadcast %0 : vector<1x64xi32> to vector<32x64xi32>
    %6 = vector.broadcast %4 : vector<32x1xi32> to vector<32x64xi32>
    %7 = arith.cmpi eq, %5, %6 : vector<32x64xi32>
    %cst = arith.constant 0.000000e+00 : f32
    %8 = vector.shape_cast %2 : vector<32x1xf32> to vector<32x1xf32>
    %9 = vector.broadcast %8 : vector<32x1xf32> to vector<32x64xf32>
    %10 = vector.broadcast %cst : f32 to vector<32x64xf32>
    %11 = arith.select %7, %9, %10 : vector<32x64xi1>, vector<32x64xf32>
    %cst_7 = arith.constant dense<0xFF800000> : vector<64xf32>
    %12 = vector.multi_reduction <maximumf>, %11, %cst_7 [0] : vector<32x64xf32> to vector<64xf32>
    %13 = vector.shape_cast %12 : vector<64xf32> to vector<1x64xf32>
    %14 = vector.broadcast %1 : vector<1x64xi32> to vector<32x64xi32>
    %15 = vector.broadcast %4 : vector<32x1xi32> to vector<32x64xi32>
    %16 = arith.cmpi eq, %14, %15 : vector<32x64xi32>
    %cst_8 = arith.constant 0.000000e+00 : f32
    %17 = vector.shape_cast %2 : vector<32x1xf32> to vector<32x1xf32>
    %18 = vector.broadcast %17 : vector<32x1xf32> to vector<32x64xf32>
    %19 = vector.broadcast %cst_8 : f32 to vector<32x64xf32>
    %20 = arith.select %16, %18, %19 : vector<32x64xi1>, vector<32x64xf32>
    %cst_9 = arith.constant dense<0xFF800000> : vector<64xf32>
    %21 = vector.multi_reduction <maximumf>, %20, %cst_9 [0] : vector<32x64xf32> to vector<64xf32>
    %22 = vector.shape_cast %21 : vector<64xf32> to vector<1x64xf32>
    %23 = arith.addf %13, %22 : vector<1x64xf32>
    %cst_10 = arith.constant 0.000000e+00 : f32
    %24 = vector.broadcast %cst_10 : f32 to vector<1x64xf32>
    %25 = arith.cmpf ogt, %23, %24 : vector<1x64xf32>
    %26 = arith.extui %25 : vector<1x64xi1> to vector<1x64xi32>
    %27 = arith.sitofp %26 : vector<1x64xi32> to vector<1x64xf32>
    %c0_11 = arith.constant 0 : index
    %c0_12 = arith.constant 0 : index
    %28 = vector.load %arg5[%c0_11, %c0_12] : memref<1x64xf32, #tpu.memory_space<vmem>>, vector<1x64xf32>
    tpu.vector_store %arg5[%c0_11, %c0_12], %27 {strides = array<i32>} : memref<1x64xf32, #tpu.memory_space<vmem>>, vector<1x64xf32>,
    %cst_13 = arith.constant -1.000000e+30 : f32
    %29 = vector.broadcast %cst_13 : f32 to vector<1x64xf32>
    %30 = arith.select %25, %3, %29 : vector<1x64xi1>, vector<1x64xf32>
    %c0_14 = arith.constant 0 : index
    %c0_15 = arith.constant 0 : index
    %31 = vector.load %arg4[%c0_14, %c0_15] : memref<1x64xf32, #tpu.memory_space<vmem>>, vector<1x64xf32>
    tpu.vector_store %arg4[%c0_14, %c0_15], %30 {strides = array<i32>} : memref<1x64xf32, #tpu.memory_space<vmem>>, vector<1x64xf32>,
    return
  }
}

module attributes {stable_mosaic.version = 11 : i64} {
  func.func @_edge_prologue_kernel(%arg0: memref<8x64xf32, #tpu.memory_space<vmem>>, %arg1: memref<8x1xf32, #tpu.memory_space<vmem>>, %arg2: memref<1x1xf32, #tpu.memory_space<vmem>>, %arg3: memref<1x64xf32, #tpu.memory_space<vmem>>, %arg4: memref<8x1xf32, #tpu.memory_space<vmem>>) attributes {dimension_semantics = [], scalar_prefetch = 0 : i64, scratch_operands = 0 : i64, tpu.core_type = #tpu.core_type<tc>} {
    %c0 = arith.constant 0 : index
    %c0_0 = arith.constant 0 : index
    %0 = vector.load %arg0[%c0, %c0_0] : memref<8x64xf32, #tpu.memory_space<vmem>>, vector<8x64xf32>
    %c0_1 = arith.constant 0 : index
    %c0_2 = arith.constant 0 : index
    %1 = vector.load %arg1[%c0_1, %c0_2] : memref<8x1xf32, #tpu.memory_space<vmem>>, vector<8x1xf32>
    %c0_3 = arith.constant 0 : index
    %c0_4 = arith.constant 0 : index
    %2 = vector.load %arg2[%c0_3, %c0_4] : memref<1x1xf32, #tpu.memory_space<vmem>>, vector<1x1xf32>
    %3 = vector.broadcast %1 : vector<8x1xf32> to vector<8x64xf32>
    %4 = arith.mulf %0, %3 : vector<8x64xf32>
    %cst = arith.constant dense<0.000000e+00> : vector<64xf32>
    %5 = vector.multi_reduction <add>, %4, %cst [0] : vector<8x64xf32> to vector<64xf32>
    %6 = vector.shape_cast %5 : vector<64xf32> to vector<1x64xf32>
    %7 = vector.broadcast %2 : vector<1x1xf32> to vector<1x64xf32>
    %8 = arith.addf %6, %7 : vector<1x64xf32>
    %c0_5 = arith.constant 0 : index
    %c0_6 = arith.constant 0 : index
    %9 = vector.load %arg3[%c0_5, %c0_6] : memref<1x64xf32, #tpu.memory_space<vmem>>, vector<1x64xf32>
    tpu.vector_store %arg3[%c0_5, %c0_6], %8 {strides = array<i32>} : memref<1x64xf32, #tpu.memory_space<vmem>>, vector<1x64xf32>,
    %cst_7 = arith.constant dense<0.000000e+00> : vector<8xf32>
    %10 = vector.multi_reduction <add>, %0, %cst_7 [1] : vector<8x64xf32> to vector<8xf32>
    %11 = vector.shape_cast %10 : vector<8xf32> to vector<8x1xf32>
    %c0_8 = arith.constant 0 : index
    %c0_9 = arith.constant 0 : index
    %12 = vector.load %arg4[%c0_8, %c0_9] : memref<8x1xf32, #tpu.memory_space<vmem>>, vector<8x1xf32>
    tpu.vector_store %arg4[%c0_8, %c0_9], %11 {strides = array<i32>} : memref<8x1xf32, #tpu.memory_space<vmem>>, vector<8x1xf32>,
    return
  }
}

module attributes {stable_mosaic.version = 11 : i64} {
  func.func @_sample_epilogue_kernel(%arg0: memref<8x64xf32, #tpu.memory_space<vmem>>, %arg1: memref<1x64xf32, #tpu.memory_space<vmem>>, %arg2: memref<8x64xf32, #tpu.memory_space<vmem>>, %arg3: memref<8x1xf32, #tpu.memory_space<vmem>>) attributes {dimension_semantics = [], scalar_prefetch = 0 : i64, scratch_operands = 0 : i64, tpu.core_type = #tpu.core_type<tc>} {
    %c0 = arith.constant 0 : index
    %c0_0 = arith.constant 0 : index
    %0 = vector.load %arg0[%c0, %c0_0] : memref<8x64xf32, #tpu.memory_space<vmem>>, vector<8x64xf32>
    %c0_1 = arith.constant 0 : index
    %c0_2 = arith.constant 0 : index
    %1 = vector.load %arg1[%c0_1, %c0_2] : memref<1x64xf32, #tpu.memory_space<vmem>>, vector<1x64xf32>
    %2 = vector.broadcast %1 : vector<1x64xf32> to vector<8x64xf32>
    %3 = arith.mulf %0, %2 : vector<8x64xf32>
    %c0_3 = arith.constant 0 : index
    %c0_4 = arith.constant 0 : index
    %4 = vector.load %arg2[%c0_3, %c0_4] : memref<8x64xf32, #tpu.memory_space<vmem>>, vector<8x64xf32>
    tpu.vector_store %arg2[%c0_3, %c0_4], %3 {strides = array<i32>} : memref<8x64xf32, #tpu.memory_space<vmem>>, vector<8x64xf32>,
    %cst = arith.constant dense<0.000000e+00> : vector<8xf32>
    %5 = vector.multi_reduction <add>, %3, %cst [1] : vector<8x64xf32> to vector<8xf32>
    %6 = vector.shape_cast %5 : vector<8xf32> to vector<8x1xf32>
    %c0_5 = arith.constant 0 : index
    %c0_6 = arith.constant 0 : index
    %7 = vector.load %arg3[%c0_5, %c0_6] : memref<8x1xf32, #tpu.memory_space<vmem>>, vector<8x1xf32>
    tpu.vector_store %arg3[%c0_5, %c0_6], %6 {strides = array<i32>} : memref<8x1xf32, #tpu.memory_space<vmem>>, vector<8x1xf32>,
    return
  }
}

</mosaic_0001>

<bundles_post_ra>
// kernel: _sampling_core.4
= control target key start
LH: loop header
LB: loop body
LE: loop exit
PB: predicated region body
PF: predicated region fallthrough
CT: control target
= control target key end

     0   :  { %v63_v0 = vmov 0   ;;  %vm27_vm0 = vcmask 523264   ;;  %v40_v7 = vlaneseq  ;;  %vm45_vm1 = vcmask 516096   ;;  %s104_s1 = inlined_call_operand.vmem [shape: f32[8,1], index: 1, kind: input, shape index: {}]   ;;  %s105_s2 = inlined_call_operand.<no memory space> [shape: f32[1,1], index: 2, kind: input, shape index: {}]   ;;  %s106_s0 = inlined_call_operand.vmem [shape: f32[8,64], index: 0, kind: input, shape index: {}]   ;;  %s107_s3 = inlined_call_operand.vmem [shape: f32[1,64], index: 3, kind: output, shape index: {0}]   ;;  %s108_s4 = inlined_call_operand.vmem [shape: f32[8,1], index: 4, kind: output, shape index: {1}]  }
   0x1   :  { %61 = vset.pattern.permute.xlu0 %v63_v0  ;;  %v19_v1 = vld [vmem:[%s104_s1] sm:$0xff]  ;;  %62 = vset.pattern.permute.xlu1 %v63_v0  ;;  %v10_v2 = vstv %s105_s2  ;;  %vm50_vm2 = vcmask 7168  }
   0x2   :  { %23 = vperm.xlu0 %61, %v19_v1   ;;  %11 = vst [vmem:[#allocation2] sm:$0x1] %v10_v2  ;;  %v18_v4 = vld [vmem:[%s106_s0] sm:$0xff]  ;;  %v41_v11 = vshrl.u32 %v40_v7, 7 }
   0x3   :  { %v47_v5 = vsel %vm27_vm0, %v18_v4, 0.0 }
   0x4   :  { %v42_v14 = vsub.s32 0, %v41_v11 }
   0x9   :  { %v20_v3 = vld [vmem:[#allocation2] sm:$0x1] }
   0xa   :  { %37 = vperm.xlu1 %62, %v20_v3  }
  0x21   :  { %48 = vadd.xlane.f32.xlu0 %v47_v5 }
  0x7d   :  { %v24_v6 = vpop.permute.xlu0 %23 }
  0x7e   :  { %v26_v8 = vmul.f32 %v24_v6, %v18_v4 }
  0x80   :  { %v28_v9 = vsel %vm27_vm0, %v26_v8, 0.0 }
  0x81   :  { %v29_v10 = vrot.slane %v28_v9, 4 }
  0x83   :  { %v30_v12 = vadd.f32 %v29_v10, %v28_v9 }
  0x85   :  { %v31_v13 = vrot.slane %v30_v12, 2  ;;  %v38_v15 = vpop.permute.xlu1 %37 }
  0x86   :  { %v43_v18 = vrot.slane %v38_v15, %v42_v14 }
  0x87   :  { %v32_v16 = vadd.f32 %v31_v13, %v30_v12 }
  0x89   :  { %v33_v17 = vrot.slane %v32_v16, 1 }
  0x8b   :  { %v34_v19 = vadd.f32 %v33_v17, %v32_v16 }
  0x8d   :  { %v44_v20 = vadd.f32 %v43_v18, %v34_v19 }
  0x8f   :  { %46 = vst.msk [vmem:[%s107_s3] sm:$0x1] %vm45_vm1, %v44_v20 }
  0xaa   :  { %v49_v21 = vpop.xlane.xlu0 %48 }
  0xab   :  { %51 = vst.msk [vmem:[%s108_s4] sm:$0xff] %vm50_vm2, %v49_v21 }

// kernel: _sampling_core.5
= control target key start
LH: loop header
LB: loop body
LE: loop exit
PB: predicated region body
PF: predicated region fallthrough
CT: control target
= control target key end

     0   :  { %v125_v0 = vmov 0   ;;  %v26_v5 = vlaneseq  ;;  %vm63_vm4 = vcmask 523264   ;;  %vm106_vm9 = vcmask 516096   ;;  %s192_s2 = inlined_call_operand.vmem [shape: f32[32,1], index: 2, kind: input, shape index: {}]   ;;  %s193_s0 = inlined_call_operand.vmem [shape: s32[1,64], index: 0, kind: input, shape index: {}]   ;;  %s194_s1 = inlined_call_operand.vmem [shape: s32[1,64], index: 1, kind: input, shape index: {}]   ;;  %s195_s3 = inlined_call_operand.vmem [shape: f32[1,64], index: 3, kind: input, shape index: {}]   ;;  %s196_s4 = inlined_call_operand.vmem [shape: f32[1,64], index: 4, kind: output, shape index: {0}]   ;;  %s197_s5 = inlined_call_operand.vmem [shape: f32[1,64], index: 5, kind: output, shape index: {1}]  }
   0x1   :  { %124 = vset.pattern.permute.xlu1 %v125_v0  ;;  %123 = vset.pattern.permute.xlu0 %v125_v0  ;;  %v23_v1 = vld [vmem:[%s192_s2 + $0x10] sm:$0xff]  ;;  %v21_v2 = vld [vmem:[%s192_s2] sm:$0xff]  ;;  %v24_v3 = vld [vmem:[%s192_s2 + $0x18] sm:$0xff]  ;;  %v126_v52 = vmov 0.0  }
   0x2   :  { %51 = vperm.xlu1 %124, %v23_v1   ;;  %41 = vperm.xlu0 %123, %v21_v2   ;;  %v22_v4 = vld [vmem:[%s192_s2 + $0x8] sm:$0xff]  ;;  %v27_v6 = vshrl.u32 %v26_v5, 7  ;;  %v118_v8 = vld [vmem:[%s193_s0] ss:$0 sm:$0xff] }
   0x3   :  { %v119_v9 = vld [vmem:[%s194_s1] ss:$0 sm:$0xff] }
   0x4   :  { %v29_v7 = vadd.s32 16, %v27_v6  ;;  %vm35_vm0 = vcmp.eq.s32.totalorder %v118_v8, %v27_v6  ;;  %vm81_vm1 = vcmp.eq.s32.totalorder %v119_v9, %v27_v6  ;;  %v30_v10 = vadd.s32 24, %v27_v6  ;;  %v25_v50 = vld [vmem:[%s195_s3] sm:$0x1] }
   0x5   :  { %v28_v11 = vadd.s32 8, %v27_v6 }
   0x6   :  { %56 = vperm.xlu1 %124, %v24_v3   ;;  %46 = vperm.xlu0 %123, %v22_v4   ;;  %vm37_vm2 = vcmp.eq.s32.totalorder %v118_v8, %v29_v7  ;;  %vm83_vm3 = vcmp.eq.s32.totalorder %v119_v9, %v29_v7  ;;  %vm38_vm5 = vcmp.eq.s32.totalorder %v118_v8, %v30_v10 }
   0x7   :  { %vm84_vm6 = vcmp.eq.s32.totalorder %v119_v9, %v30_v10  ;;  %vm36_vm7 = vcmp.eq.s32.totalorder %v118_v8, %v28_v11  ;;  %vm82_vm8 = vcmp.eq.s32.totalorder %v119_v9, %v28_v11 }
  0x7d   :  { %v52_v12 = vpop.permute.xlu1 %51  ;;  %v42_v13 = vpop.permute.xlu0 %41 }
  0x7e   :  { %v61_v14 = vsel %vm37_vm2, %v52_v12, 0.0  ;;  %v87_v15 = vsel %vm83_vm3, %v52_v12, 0.0  ;;  %v59_v16 = vsel %vm35_vm0, %v42_v13, 0.0  ;;  %v85_v17 = vsel %vm81_vm1, %v42_v13, 0.0 }
  0x7f   :  { %v66_v18 = vsel %vm63_vm4, %v61_v14, -inf  ;;  %v91_v19 = vsel %vm63_vm4, %v87_v15, -inf  ;;  %v64_v20 = vsel %vm63_vm4, %v59_v16, -inf  ;;  %v89_v21 = vsel %vm63_vm4, %v85_v17, -inf }
  0x81   :  { %v57_v22 = vpop.permute.xlu1 %56  ;;  %v47_v23 = vpop.permute.xlu0 %46 }
  0x82   :  { %v62_v24 = vsel %vm38_vm5, %v57_v22, 0.0  ;;  %v88_v25 = vsel %vm84_vm6, %v57_v22, 0.0  ;;  %v60_v26 = vsel %vm36_vm7, %v47_v23, 0.0  ;;  %v86_v27 = vsel %vm82_vm8, %v47_v23, 0.0 }
  0x83   :  { %v67_v28 = vsel %vm63_vm4, %v62_v24, -inf  ;;  %v92_v29 = vsel %vm63_vm4, %v88_v25, -inf  ;;  %v65_v30 = vsel %vm63_vm4, %v60_v26, -inf  ;;  %v90_v31 = vsel %vm63_vm4, %v86_v27, -inf }
  0x84   :  { %v69_v32 = vmax.f32 %v66_v18, %v67_v28  ;;  %v94_v33 = vmax.f32 %v91_v19, %v92_v29  ;;  %v68_v34 = vmax.f32 %v64_v20, %v65_v30  ;;  %v93_v35 = vmax.f32 %v89_v21, %v90_v31 }
  0x86   :  { %v70_v36 = vmax.f32 %v68_v34, %v69_v32  ;;  %v95_v37 = vmax.f32 %v93_v35, %v94_v33 }
  0x88   :  { %v71_v38 = vrot.slane %v70_v36, 4  ;;  %v96_v39 = vrot.slane %v95_v37, 4 }
  0x8a   :  { %v72_v40 = vmax.f32 %v70_v36, %v71_v38  ;;  %v97_v41 = vmax.f32 %v95_v37, %v96_v39 }
  0x8c   :  { %v73_v42 = vrot.slane %v72_v40, 2  ;;  %v98_v43 = vrot.slane %v97_v41, 2 }
  0x8e   :  { %v74_v44 = vmax.f32 %v72_v40, %v73_v42  ;;  %v99_v45 = vmax.f32 %v97_v41, %v98_v43 }
  0x90   :  { %v75_v46 = vrot.slane %v74_v44, 1  ;;  %v100_v47 = vrot.slane %v99_v45, 1 }
  0x92   :  { %v76_v48 = vmax.f32 %v74_v44, %v75_v46  ;;  %v101_v49 = vmax.f32 %v99_v45, %v100_v47 }
  0x94   :  { %v102_v51 = vadd.f32 %v101_v49, %v76_v48 }
  0x96   :  { %vm103_vm10 = vcmp.gt.f32.partialorder %v102_v51, 0.0 }
  0x97   :  { %v120_v53 = vsel %vm103_vm10, 1.0, %v126_v52  ;;  %v108_v54 = vsel %vm103_vm10, %v25_v50, -1e+30 }
  0x98   :  { %107 = vst.msk [vmem:[%s197_s5] sm:$0x1] %vm106_vm9, %v120_v53  ;;  %109 = vst.msk [vmem:[%s196_s4] sm:$0x1] %vm106_vm9, %v108_v54 }

// kernel: neg.9
= control target key start
LH: loop header
LB: loop body
LE: loop exit
PB: predicated region body
PF: predicated region fallthrough
CT: control target
= control target key end

     0   :  { %s24_s0 = inlined_call_operand.vmem [shape: f32[8], index: 0, kind: input, shape index: {}]   ;;  %s25_s1 = inlined_call_operand.vmem [shape: f32[8], index: 1, kind: output, shape index: {}]  }
   0x1   :  { %v2_v0 = vld [vmem:[%s24_s0] sm:$0x1] }
   0x2   :  { %v5_v1 = vxor.u32 2147483648, %v2_v0 }
   0x4   :  { %7 = vst [vmem:[%s25_s1] sm:$0x1] %v5_v1 }

// kernel: div.1
= control target key start
LH: loop header
LB: loop body
LE: loop exit
PB: predicated region body
PF: predicated region fallthrough
CT: control target
= control target key end

     0   :  { %3 = vsyncpa [#allocation1], 0  ;;  %s72_s0 = inlined_call_operand.vmem [shape: f32[8], index: 0, kind: input, shape index: {}]   ;;  %s73_s1 = inlined_call_operand.vmem [shape: f32[8], index: 1, kind: input, shape index: {}]   ;;  %s74_s2 = inlined_call_operand.hbm [shape: f32[8], index: 2, kind: output, shape index: {}]  }
   0x1   :  { %v5_v0 = vld [vmem:[%s73_s1] sm:$0x1] }
   0x2   :  { %23 = vrcp.f32 %v5_v0  ;;  %v4_v1 = vld [vmem:[%s72_s0] sm:$0x1]  ;;  %s47_s0 = smov [#allocation0]  }
   0x3   :  { %s16_s12 = sshll.u32 %s47_s0, 4  ;;  %s17_s12 = int_to_ptr.vmem [resolvable:$true] %s16_s12 }
   0x4   :  { %s25_s13 = scalar_lea.vmem %s17_s12, 16  ;;  %s29_s14 = scalar_lea.vmem %s17_s12, 32 }
   0x5   :  { %p26_p0 = scmp.ne.s32.totalorder %s17_s12, %s25_s13  ;;  %p30_p1 = scmp.lt.s32.totalorder %s17_s12, %s17_s12 }
   0x6   :  { %p31_p2 = scmp.lt.s32.totalorder %s29_s14, %s25_s13 }
   0x8   :  { %p32_p3 = por %p31_p2, %p30_p1 }
   0xa   :  { %p33_p4 = pnand %p32_p3, %p26_p0 }
   0xf   :  { %v24_v2 = vpop.eup %23 }
  0x10   :  { %v9_v3 = vmul.f32 %v24_v2, %v4_v1 }
  0x12   :  { %11 = vst [vmem:[#allocation0] sm:$0x1] %v9_v3 }
  0x13   :  { %36 = shalt.err (!%p33_p4)
}
  0x14   :  { %19 = dma.vmem_to_hbm [thread:$0]  %s17_s12, 16, %s74_s2, [#allocation1]  }
  0x15   :  { %45 = dma.done.wait [#allocation1], 16  }
  0x16   :  { %46 = vsyncadd [#allocation1], 4294967280 }
  0x17   :  { %21 = vsyncpa [#allocation1], 1 }

// kernel: _sampling_core.7
= control target key start
LH: loop header
LB: loop body
LE: loop exit
PB: predicated region body
PF: predicated region fallthrough
CT: control target
= control target key end

     0   :  { %vm23_vm0 = vcmask 523264   ;;  %s105_s0 = inlined_call_operand.vmem [shape: f32[8,64], index: 0, kind: input, shape index: {}]   ;;  %s106_s1 = inlined_call_operand.vmem [shape: f32[1,64], index: 1, kind: input, shape index: {}]   ;;  %s107_s2 = inlined_call_operand.hbm [shape: f32[8,64], index: 2, kind: output, shape index: {0}]   ;;  %s108_s3 = inlined_call_operand.vmem [shape: f32[8,1], index: 3, kind: output, shape index: {1}]  }
   0x1   :  { %v14_v0 = vld [vmem:[%s105_s0] sm:$0xff] }
   0x2   :  { %v48_v1 = vld [vmem:[%s106_s1] ss:$0 sm:$0xff] }
   0x3   :  { %9 = vsyncpa [#allocation3], 0  ;;  %v22_v2 = vmul.f32 %v48_v1, %v14_v0  ;;  %s72_s16 = smov [#allocation2]  }
   0x4   :  { %s36_s17 = sshll.u32 %s72_s16, 4  ;;  %s37_s17 = int_to_ptr.vmem [resolvable:$true] %s36_s17 }
   0x5   :  { %v25_v3 = vsel %vm23_vm0, %v22_v2, 0.0  ;;  %24 = vst.msk [vmem:[#allocation2] sm:$0xff] %vm23_vm0, %v22_v2  ;;  %s50_s18 = scalar_lea.vmem %s37_s17, 128  ;;  %p55_p1 = scmp.lt.s32.totalorder %s37_s17, %s37_s17 }
   0x6   :  { %26 = vadd.xlane.f32.xlu0 %v25_v3  ;;  %p51_p0 = scmp.ne.s32.totalorder %s37_s17, %s50_s18  ;;  %p56_p2 = scmp.lt.s32.totalorder %s50_s18, %s50_s18 }
   0x8   :  { %p57_p3 = por %p56_p2, %p55_p1 }
   0xa   :  { %p58_p4 = pnand %p57_p3, %p51_p0 }
   0xc   :  { %61 = shalt.err (!%p58_p4)
}
   0xd   :  { %39 = dma.vmem_to_hbm [thread:$0]  %s37_s17, 128, %s107_s2, [#allocation3]   ;;  %vm28_vm1 = vcmask 7168  }
  0x8f   :  { %v27_v4 = vpop.xlane.xlu0 %26 }
  0x90   :  { %29 = vst.msk [vmem:[%s108_s3] sm:$0xff] %vm28_vm1, %v27_v4 }
  0x91   :  { %70 = dma.done.wait [#allocation3], 128  }
  0x92   :  { %71 = vsyncadd [#allocation3], 4294967168 }
  0x93   :  { %47 = vsyncpa [#allocation3], 1 }

</bundles_post_ra>
